<compile_context>
chip_gen: v7x
topology: tpu7x:2x2x1
jax: 0.10.0
libtpu: 0.0.40
codegen_flags: <defaults>
</compile_context>

<pallas_src>
import functools

import jax
import jax.numpy as jnp
from jax.experimental import pallas as pl
from jax.experimental.pallas import tpu as pltpu


# ----------------------------------------------------------------------------
# Kernels
# ----------------------------------------------------------------------------
def _linear_kernel_f32(x_ref, w_ref, b_ref, o_ref):
    # x_ref : (tm, tk) bf16   w_ref : (tk, tn) bf16   b_ref : (1, tn) f32
    # o_ref : (tm, tn) f32 -- VMEM-resident across the k axis (index (i, j)).
    k = pl.program_id(2)

    @pl.when(k == 0)
    def _():
        o_ref[...] = jnp.broadcast_to(b_ref[...], o_ref.shape)

    o_ref[...] += jnp.dot(x_ref[...], w_ref[...],
                          preferred_element_type=jnp.float32)


def _linear_kernel_acc(x_ref, w_ref, b_ref, o_ref, acc_ref):
    # Same contraction, but with an f32 scratch accumulator for non-f32 outputs.
    k = pl.program_id(2)

    @pl.when(k == 0)
    def _():
        acc_ref[...] = jnp.broadcast_to(b_ref[...], acc_ref.shape)

    acc_ref[...] += jnp.dot(x_ref[...], w_ref[...],
                            preferred_element_type=jnp.float32)

    @pl.when(k == pl.num_programs(2) - 1)
    def _():
        o_ref[...] = acc_ref[...].astype(o_ref.dtype)


# ----------------------------------------------------------------------------
# Tile selection helpers (all trace-time Python)
# ----------------------------------------------------------------------------
def _round_up(v, m):
    return ((v + m - 1) // m) * m


def _largest_tile(dim, cap, step):
    """Largest multiple of `step` that divides `dim` (a multiple of `step`)
    and is <= cap (falls back to `step`, which always divides)."""
    d = min(cap, dim)
    d -= d % step
    while d >= step:
        if dim % d == 0:
            return d
        d -= step
    return step


def _pick_tm(batch, cap=512):
    """Pick an M tile (multiple of 8, <= cap) keeping padding waste <= ~12.5%."""
    b = max(int(batch), 1)
    allowed = max(b // 8, 7)
    for tm in (512, 256, 128, 64, 32, 16, 8):
        if tm > cap:
            continue
        bp = _round_up(b, tm)
        if bp - b <= allowed:
            return tm, bp
    return 8, _round_up(b, 8)


# ----------------------------------------------------------------------------
# Forward
# ----------------------------------------------------------------------------
@functools.partial(jax.jit, static_argnames=("out_features",))
def _prior_hyper_linear_impl(x, w_t, bias2, *, out_features):
    """x: (B, IN) f32;  w_t: (Kp, Np) bf16 pre-transposed+padded;  bias2: (1, Np) f32."""
    B, IN = x.shape
    Kp, Np = w_t.shape
    out_dtype = x.dtype
    compute_dtype = w_t.dtype

    # ---- tile selection (static) -------------------------------------------
    tm, Bp = _pick_tm(B, cap=512)
    tn = _largest_tile(Np, 512, 128)
    tk = _largest_tile(Kp, 1024 if Kp >= 1024 else 512, 128)
    # v7x megacore parity: make sure there are >= 2 parallel tiles when possible.
    if (Bp // tm) * (Np // tn) < 2 and Np >= 256:
        tn = _largest_tile(Np, Np // 2, 128)

    # ---- per-call input prep: cast x to bf16, pad only x --------------------
    xc = x.astype(compute_dtype)
    if (Bp, Kp) != (B, IN):
        xc = jnp.pad(xc, ((0, Bp - B), (0, Kp - IN)))

    grid = (Bp // tm, Np // tn, Kp // tk)
    m_tiles, n_tiles, _ = grid

    xw_bytes = jnp.dtype(compute_dtype).itemsize
    out_bytes = jnp.dtype(out_dtype).itemsize
    use_acc = out_dtype != jnp.float32
    kernel = _linear_kernel_acc if use_acc else _linear_kernel_f32
    scratch = [pltpu.VMEM((tm, tn), jnp.float32)] if use_acc else []

    # Double-buffered operand/output tiles + optional accumulator, with margin.
    vmem_needed = (2 * (tm * tk * xw_bytes + tk * tn * xw_bytes + tn * 4)
                   + 2 * tm * tn * out_bytes
                   + (tm * tn * 4 if use_acc else 0))
    vmem_limit = int(min(48 * 2**20, max(vmem_needed + 4 * 2**20, 16 * 2**20)))

    out = pl.pallas_call(
        kernel,
        out_shape=jax.ShapeDtypeStruct((Bp, Np), out_dtype),
        grid_spec=pltpu.PrefetchScalarGridSpec(
            num_scalar_prefetch=0,
            grid=grid,
            in_specs=[
                pl.BlockSpec((tm, tk), lambda i, j, k: (i, k)),  # x tile (bf16)
                pl.BlockSpec((tk, tn), lambda i, j, k: (k, j)),  # weight tile, (IN, OUT) layout
                pl.BlockSpec((1, tn), lambda i, j, k: (0, j)),   # bias tile (f32)
            ],
            out_specs=pl.BlockSpec((tm, tn), lambda i, j, k: (i, j)),
            scratch_shapes=scratch,
        ),
        compiler_params=pltpu.CompilerParams(
            dimension_semantics=("parallel", "parallel", "arbitrary"),
            vmem_limit_bytes=vmem_limit,
        ),
        cost_estimate=pl.CostEstimate(
            flops=2 * Bp * Kp * Np,
            transcendentals=0,
            bytes_accessed=(xw_bytes * Bp * Kp * n_tiles      # x re-read per N tile
                            + xw_bytes * Kp * Np * m_tiles    # w re-read per M tile
                            + out_bytes * Bp * Np             # output write
                            + 4 * Np),                        # bias
        ),
    )(xc, w_t, bias2)

    if (Bp, Np) != (B, out_features):
        out = out[:B, :out_features]
    return out


def prepare_prior_hyper_linear_params(weight, bias, compute_dtype=jnp.bfloat16):
    """One-time parameter prep (amortized across calls): transpose the static
    weight to (IN, OUT), zero-pad to (8,128)-aligned dims, cast to the MXU
    compute dtype, and pad the bias.  Padding is exact for a linear layer."""
    OUT, IN = weight.shape
    Kp = _round_up(IN, 128)
    Np = _round_up(OUT, 128)
    w_t = jnp.transpose(weight)                       # (IN, OUT): NN contraction in-kernel
    if (Kp, Np) != (IN, OUT):
        w_t = jnp.pad(w_t, ((0, Kp - IN), (0, Np - OUT)))
    w_t = w_t.astype(compute_dtype)
    b2 = bias.astype(jnp.float32).reshape(1, OUT)
    if Np != OUT:
        b2 = jnp.pad(b2, ((0, 0), (0, Np - OUT)))
    return {"w_t": w_t, "bias": b2, "in_features": IN, "out_features": OUT}


def prior_hyper_linear(x, params):
    """out = x @ weight.T + bias (PriorHyperLinear.forward)."""
    assert x.shape[-1] == params["in_features"]
    return _prior_hyper_linear_impl(
        x, params["w_t"], params["bias"], out_features=params["out_features"])


def make_prior_hyper_linear_params(key, input_size, output_size,
                                   prior_mean=0.0, prior_std=1.0):
    """Deterministic parameter construction mirroring PriorHyperLinear.__init__."""
    w = jax.random.normal(key, (output_size, input_size), dtype=jnp.float32)
    # row-wise L2 normalization (np.linalg.norm(..., axis=1, keepdims=True))
    w = w / jnp.linalg.norm(w, axis=1, keepdims=True)
    prior_std = jnp.asarray(prior_std, dtype=jnp.float32)
    if prior_std.ndim == 0:
        weight = w * prior_std                    # eye(OUT)*std @ w == std * w (identical)
    elif prior_std.ndim == 1:
        weight = w * prior_std[:, None]           # diag(std) @ w
    elif prior_std.ndim == 2:
        weight = prior_std @ w
    else:
        raise ValueError("prior_std must be scalar, 1-D, or 2-D")
    prior_mean = jnp.asarray(prior_mean, dtype=jnp.float32)
    bias = (prior_mean if prior_mean.ndim == 1
            else jnp.ones((output_size,), jnp.float32) * prior_mean)
    return weight, bias


if __name__ == "__main__":
    key = jax.random.PRNGKey(0)
    k_w, k_x, k_w2, k_x2 = jax.random.split(key, 4)

    # --- small, module-scale test (single grid step, padded to (8,128)) ---
    batch, in_features, out_features = 8, 32, 16
    weight, bias = make_prior_hyper_linear_params(
        k_w, in_features, out_features, prior_mean=0.5, prior_std=2.0)
    params = prepare_prior_hyper_linear_params(weight, bias)
    x = jax.random.normal(k_x, (batch, in_features), dtype=jnp.float32)

    out = jax.block_until_ready(prior_hyper_linear(x, params))
    ref = x @ weight.T + bias
    assert out.shape == (batch, out_features)
    assert out.dtype == x.dtype
    # bf16 operands with f32 accumulation vs. the f32 reference
    assert jnp.allclose(out, ref, atol=2e-2, rtol=2e-2), "small-shape mismatch"

    # --- medium shape exercising the tiled (M, N, K) grid + K accumulation ---
    B2, IN2, OUT2 = 64, 1536, 384
    weight2, bias2 = make_prior_hyper_linear_params(
        k_w2, IN2, OUT2, prior_mean=-0.25, prior_std=1.5)
    params2 = prepare_prior_hyper_linear_params(weight2, bias2)
    x2 = jax.random.normal(k_x2, (B2, IN2), dtype=jnp.float32)

    out2 = jax.block_until_ready(prior_hyper_linear(x2, params2))
    ref2 = x2 @ weight2.T + bias2
    assert out2.shape == (B2, OUT2)
    assert jnp.allclose(out2, ref2, atol=5e-2, rtol=5e-2), "tiled-shape mismatch"

    print("KERNEL_OK")
</pallas_src>

<mosaic_0001>
module attributes {stable_mosaic.version = 11 : i64} {
  func.func @_linear_kernel_f32(%arg0: i32, %arg1: i32, %arg2: i32, %arg3: memref<8x128xbf16, #tpu.memory_space<vmem>>, %arg4: memref<128x128xbf16, #tpu.memory_space<vmem>>, %arg5: memref<1x128xf32, #tpu.memory_space<vmem>>, %arg6: memref<8x128xf32, #tpu.memory_space<vmem>>) attributes {dimension_semantics = [#tpu.dimension_semantics<parallel>, #tpu.dimension_semantics<parallel>, #tpu.dimension_semantics<arbitrary>], iteration_bounds = array<i64: 1, 1, 1>, scalar_prefetch = 0 : i64, scratch_operands = 0 : i64, tpu.core_type = #tpu.core_type<tc>, window_params = [{transform_indices = @transform_0, window_bounds = array<i64: 8, 128>}, {transform_indices = @transform_1, window_bounds = array<i64: 128, 128>}, {transform_indices = @transform_2, window_bounds = array<i64: 1, 128>}, {transform_indices = @transform_3, window_bounds = array<i64: 8, 128>}]} {
    %c0_i32 = arith.constant 0 : i32
    %0 = arith.cmpi eq, %arg2, %c0_i32 : i32
    %1 = arith.extui %0 : i1 to i32
    %c0_i32_0 = arith.constant 0 : i32
    %2 = arith.cmpi ne, %1, %c0_i32_0 : i32
    scf.if %2 {
      %c0_8 = arith.constant 0 : index
      %c0_9 = arith.constant 0 : index
      %9 = vector.load %arg5[%c0_8, %c0_9] : memref<1x128xf32, #tpu.memory_space<vmem>>, vector<1x128xf32>
      %10 = vector.shape_cast %9 : vector<1x128xf32> to vector<1x128xf32>
      %11 = vector.broadcast %10 : vector<1x128xf32> to vector<8x128xf32>
      %c0_10 = arith.constant 0 : index
      %c0_11 = arith.constant 0 : index
      %12 = vector.load %arg6[%c0_10, %c0_11] : memref<8x128xf32, #tpu.memory_space<vmem>>, vector<8x128xf32>
      tpu.vector_store %arg6[%c0_10, %c0_11], %11 {strides = array<i32>} : memref<8x128xf32, #tpu.memory_space<vmem>>, vector<8x128xf32>,
    } else {
    }
    %c0 = arith.constant 0 : index
    %c0_1 = arith.constant 0 : index
    %3 = vector.load %arg6[%c0, %c0_1] : memref<8x128xf32, #tpu.memory_space<vmem>>, vector<8x128xf32>
    %c0_2 = arith.constant 0 : index
    %c0_3 = arith.constant 0 : index
    %4 = vector.load %arg3[%c0_2, %c0_3] : memref<8x128xbf16, #tpu.memory_space<vmem>>, vector<8x128xbf16>
    %c0_4 = arith.constant 0 : index
    %c0_5 = arith.constant 0 : index
    %5 = vector.load %arg4[%c0_4, %c0_5] : memref<128x128xbf16, #tpu.memory_space<vmem>>, vector<128x128xbf16>
    %cst = arith.constant dense<0.000000e+00> : vector<8x128xf32>
    %6 = tpu.matmul %4, %5, %cst {dimension_numbers = #tpu.dot_dimension_numbers<[1], [0], [0], [1], [0, 0, 1, 1], [], []>} : vector<8x128xbf16>, vector<128x128xbf16>, vector<8x128xf32> -> vector<8x128xf32>
    %7 = arith.addf %3, %6 : vector<8x128xf32>
    %c0_6 = arith.constant 0 : index
    %c0_7 = arith.constant 0 : index
    %8 = vector.load %arg6[%c0_6, %c0_7] : memref<8x128xf32, #tpu.memory_space<vmem>>, vector<8x128xf32>
    tpu.vector_store %arg6[%c0_6, %c0_7], %7 {strides = array<i32>} : memref<8x128xf32, #tpu.memory_space<vmem>>, vector<8x128xf32>,
    return
  }
  func.func @transform_0(%arg0: i32, %arg1: i32, %arg2: i32) -> (i32, i32) {
    %c0_i32 = arith.constant 0 : i32
    return %arg0, %arg2 : i32, i32
  }
  func.func @transform_1(%arg0: i32, %arg1: i32, %arg2: i32) -> (i32, i32) {
    %c0_i32 = arith.constant 0 : i32
    return %arg2, %arg1 : i32, i32
  }
  func.func @transform_2(%arg0: i32, %arg1: i32, %arg2: i32) -> (i32, i32) {
    %c0_i32 = arith.constant 0 : i32
    %c0_i32_0 = arith.constant 0 : i32
    return %c0_i32, %arg1 : i32, i32
  }
  func.func @transform_3(%arg0: i32, %arg1: i32, %arg2: i32) -> (i32, i32) {
    %c0_i32 = arith.constant 0 : i32
    return %arg0, %arg1 : i32, i32
  }
}

</mosaic_0001>

<bundles_post_ra>
// kernel: _prior_hyper_linear_impl.1
= control target key start
LH: loop header
LB: loop body
LE: loop exit
PB: predicated region body
PF: predicated region fallthrough
CT: control target
= control target key end

     0   :  { %8 = vsyncpa [#allocation3], 0  ;;  %s321_s0 = inlined_call_operand.vmem [shape: bf16[8,128], index: 0, kind: input, shape index: {}]   ;;  %s322_s1 = inlined_call_operand.hbm [shape: bf16[128,128], index: 1, kind: input, shape index: {}]   ;;  %s323_s2 = inlined_call_operand.vmem [shape: f32[1,128], index: 2, kind: input, shape index: {}]   ;;  %s324_s3 = inlined_call_operand.hbm [shape: f32[8,128], index: 3, kind: output, shape index: {}]  }
   0x1   :  { %9 = vsyncpa [#allocation4], 0  ;;  %s265_s12 = smov [#allocation2]   ;;  %s217_s16 = scalar_lea.hbm %s322_s1, 1024 }
   0x2   :  { %s17_s13 = sshll.u32 %s265_s12, 4  ;;  %p218_p0 = scmp.ne.s32.totalorder %s322_s1, %s217_s16  ;;  %s18_s13 = int_to_ptr.vmem [resolvable:$true] %s17_s13 }
   0x3   :  { %p221_p1 = scmp.lt.u32.totalorder %s217_s16, %s322_s1 }
   0x5   :  { %p223_p2 = pnand %p221_p1, %p218_p0 }
   0x7   :  { %226 = shalt.err (!%p223_p2)
}
   0x8   :  { %s227_s21 = scalar_lea.vmem %s18_s13, 1024  ;;  %p232_p4 = scmp.lt.s32.totalorder %s18_s13, %s18_s13 }
   0x9   :  { %p228_p3 = scmp.ne.s32.totalorder %s18_s13, %s227_s21  ;;  %p233_p5 = scmp.lt.s32.totalorder %s227_s21, %s227_s21 }
   0xb   :  { %p234_p6 = por %p233_p5, %p232_p4 }
   0xd   :  { %p235_p7 = pnand %p234_p6, %p228_p3 }
   0xf   :  { %238 = shalt.err (!%p235_p7)
}
  0x10   :  { %s266_s22 = smov 64   ;;  %s267_s23 = smov 4  }
  0x11   :  { %23 = dma.hbm_to_vmem [thread:$0]  %s322_s1, 1024, %s18_s13, [#allocation3], %s266_s22, %s266_s22, %s267_s23  }
  0x12   :  { %261 = dma.done.wait [#allocation3], 1024  }
  0x13   :  { %262 = vsyncadd [#allocation3], 4294966272  ;;  %v268_v0 = vmov 0.0   ;;  %vm269_vm0 = vmmov 0   ;;  %v209_v1 = vld [vmem:[#allocation2] sm:$0xff]   ;;  %v210_v2 = vld [vmem:[#allocation2 + $0x8] sm:$0xff]  }
  0x14   :  { %183 = vmatprep.subr.bf16.mxu0 %v268_v0  ;;  %199 = vmatprep.mubr.msk.bf16.mxu0 %vm269_vm0, %v268_v0  ;;  %v211_v3 = vld [vmem:[#allocation2 + $0x10] sm:$0xff]   ;;  %v212_v4 = vld [vmem:[#allocation2 + $0x18] sm:$0xff]   ;;  %v213_v5 = vld [vmem:[#allocation2 + $0x20] sm:$0xff]   ;;  %s270_s29 = smov [#allocation5]  }
  0x15   :  { %184 = vmatpush3.bf16.msra.mxu0 %v209_v1  ;;  %v214_v6 = vld [vmem:[#allocation2 + $0x28] sm:$0xff]   ;;  %v215_v7 = vld [vmem:[#allocation2 + $0x30] sm:$0xff]   ;;  %v216_v8 = vld [vmem:[#allocation2 + $0x38] sm:$0xff]   ;;  %s156_s30 = sshll.u32 %s270_s29, 4  ;;  %s157_s30 = int_to_ptr.vmem [resolvable:$true] %s156_s30 }
  0x16   :  { %185 = vmatprep.subr.bf16.mxu0 %v268_v0  ;;  %v43_v9 = vld [vmem:[%s321_s0] sm:$0xf]  ;;  %s239_s4 = scalar_lea.vmem %s157_s30, 128  ;;  %p244_p9 = scmp.lt.s32.totalorder %s157_s30, %s157_s30 }
  0x17   :  { %v165_v10 = vld [vmem:[%s323_s2] ss:$0 sm:$0xff]  ;;  %p240_p8 = scmp.ne.s32.totalorder %s157_s30, %s239_s4  ;;  %p245_p10 = scmp.lt.s32.totalorder %s239_s4, %s239_s4 }
  0x19   :  { %186 = vmatpush3.bf16.msra.mxu0 %v210_v2  ;;  %p246_p11 = por %p245_p10, %p244_p9 }
  0x1a   :  { %187 = vmatprep.subr.bf16.mxu0 %v268_v0 }
  0x1b   :  { %p247_p12 = pnand %p246_p11, %p240_p8 }
  0x1d   :  { %188 = vmatpush3.bf16.msra.mxu0 %v211_v3 }
  0x1e   :  { %189 = vmatprep.subr.bf16.mxu0 %v268_v0 }
  0x21   :  { %190 = vmatpush3.bf16.msra.mxu0 %v212_v4 }
  0x22   :  { %191 = vmatprep.subr.bf16.mxu0 %v268_v0 }
  0x25   :  { %192 = vmatpush3.bf16.msra.mxu0 %v213_v5 }
  0x26   :  { %193 = vmatprep.subr.bf16.mxu0 %v268_v0 }
  0x29   :  { %194 = vmatpush3.bf16.msra.mxu0 %v214_v6 }
  0x2a   :  { %195 = vmatprep.subr.bf16.mxu0 %v268_v0 }
  0x2d   :  { %196 = vmatpush3.bf16.msra.mxu0 %v215_v7 }
  0x2e   :  { %197 = vmatprep.subr.bf16.mxu0 %v268_v0 }
  0x31   :  { %198 = vmatpush3.bf16.msra.mxu0 %v216_v8 }
  0x34   :  { %200 = vmatmul.mubr.bf16.vlgmr.msra.gmra.mrb[0].mxu0 %v43_v9 }
 0x107   :  { %v142_v11 = vpop.f32.mrb[0].mxu0 }
 0x108   :  { %v148_v12 = vadd.f32 %v165_v10, %v142_v11  ;;  %v201_v13 = vpop.f32.mrb[1].mxu0 }
 0x109   :  { %v145_v14 = vpop.f32.mrb[2].mxu0 }
 0x10a   :  { %149 = vst [vmem:[#allocation5] sm:$0xff] %v148_v12  ;;  %v202_v15 = vpop.f32.mrb[3].mxu0 }
 0x10b   :  { %250 = shalt.err (!%p247_p12)
}
 0x10c   :  { %s251_s2 = scalar_lea.hbm %s324_s3, 128 }
 0x10d   :  { %p252_p13 = scmp.ne.s32.totalorder %s324_s3, %s251_s2  ;;  %p255_p0 = scmp.lt.u32.totalorder %s251_s2, %s324_s3 }
 0x10f   :  { %p257_p1 = pnand %p255_p0, %p252_p13 }
 0x111   :  { %260 = shalt.err (!%p257_p1)
}
 0x112   :  { %159 = dma.vmem_to_hbm [thread:$0]  %s157_s30, 128, %s324_s3, [#allocation4]  }
 0x113   :  { %263 = dma.done.wait [#allocation4], 128  }
 0x114   :  { %264 = vsyncadd [#allocation4], 4294967168 }
 0x115   :  { %163 = vsyncpa [#allocation3], 1 }
 0x116   :  { %164 = vsyncpa [#allocation4], 1 }

</bundles_post_ra>
